<compile_context>
chip_gen: v6e
topology: v6e:2x2x1
jax: 0.10.0
libtpu: 0.0.40
codegen_flags: <defaults>
</compile_context>

<pallas_src>
import functools

import jax
import jax.numpy as jnp
from jax.experimental import pallas as pl
from jax.experimental.pallas import tpu as pltpu


def _round_up(x, m):
    return (x + m - 1) // m * m


def _pad_to(x, shape):
    pads = [(0, t - s) for s, t in zip(x.shape, shape)]
    return jnp.pad(x, pads)


def _critic_kernel(info_ref, states_ref,
                   w1_ref, b1_ref, w2_ref, b2_ref,
                   w3a_ref, w3b_ref, b3_ref,
                   w4_ref, b4_ref,
                   out_ref, *, q_col):
    # ---- feature_extractor: two Linear+ReLU layers on the MXU ----
    states = states_ref[...]                                     # [TB, S]
    h1 = jnp.dot(states, w1_ref[...],
                 preferred_element_type=jnp.float32) + b1_ref[...]
    h1 = jnp.maximum(h1, 0.0)                                    # [TB, PH]
    sf = jnp.dot(h1, w2_ref[...],
                 preferred_element_type=jnp.float32) + b2_ref[...]
    sf = jnp.maximum(sf, 0.0)                                    # [TB, PF]
    # (padding lanes of sf are exactly zero: zero weights/bias -> ReLU(0)=0)

    # ---- critic_model: Linear(concat(info, sf)) == info@W3a + sf@W3b ----
    info = info_ref[...]                                         # [TB, A]
    h3 = (jnp.dot(info, w3a_ref[...], preferred_element_type=jnp.float32)
          + jnp.dot(sf, w3b_ref[...], preferred_element_type=jnp.float32)
          + b3_ref[...])
    h3 = jnp.maximum(h3, 0.0)                                    # [TB, PC]

    # Final N=1 layer as VPU multiply + lane reduce (keeps MXU out of a
    # 1-output-lane matmul); w4 is stored as a zero-padded row [1, PC].
    q = jnp.sum(h3 * w4_ref[...], axis=-1, keepdims=True) + b4_ref[...]  # [TB,1]

    # Pack q into lane `q_col` of the (zero-padded) state_features slab so
    # the tile writeback is a single lane-dense 128-wide store.
    col = jax.lax.broadcasted_iota(jnp.int32, sf.shape, 1)
    out_ref[...] = jnp.where(col == q_col, q, sf)


def critic_forward(info_from_agents, states, params, *, tb=512):
    """info_from_agents: [B, N, A] f32, states: [B, S] f32 -> dict."""
    B, S = states.shape
    info_flat = info_from_agents.reshape(B, -1)                  # plain-JAX glue
    A = info_flat.shape[1]

    hidden = params["w1"].shape[1]
    feat = params["w2"].shape[1]
    chid = params["w3b"].shape[1]

    # Lane-padded model dims (zero padding preserves the math exactly).
    PH = _round_up(hidden, 128)
    PF = _round_up(feat + 1, 128)          # +1 lane reserved for q_tot
    PC = _round_up(chid, 128)
    q_col = feat

    w1 = _pad_to(params["w1"], (S, PH))
    b1 = _pad_to(params["b1"], (1, PH))
    w2 = _pad_to(params["w2"], (PH, PF))
    b2 = _pad_to(params["b2"], (1, PF))
    w3a = _pad_to(params["w3a"], (A, PC))
    w3b = _pad_to(params["w3b"], (PF, PC))
    b3 = _pad_to(params["b3"], (1, PC))
    w4 = _pad_to(params["w4"].T, (1, PC))  # stored as a row for the VPU reduce
    b4 = params["b4"]                      # [1, 1]

    # Batch tiling: TB multiple of 8 sublanes, batch padded to a TB multiple.
    TB = min(tb, _round_up(B, 8))
    B_pad = _round_up(B, TB)
    if B_pad != B:
        states_p = jnp.pad(states, ((0, B_pad - B), (0, 0)))
        info_p = jnp.pad(info_flat, ((0, B_pad - B), (0, 0)))
    else:
        states_p, info_p = states, info_flat

    def act_spec(d):
        return pl.BlockSpec((TB, d), lambda i: (i, 0))

    def resident_spec(shape):
        # Constant index map -> fetched once, VMEM-resident across the grid.
        return pl.BlockSpec(shape, lambda i: (0, 0))

    out = pl.pallas_call(
        functools.partial(_critic_kernel, q_col=q_col),
        out_shape=jax.ShapeDtypeStruct((B_pad, PF), jnp.float32),
        grid=(B_pad // TB,),
        in_specs=[
            act_spec(A),                    # info_flat tile
            act_spec(S),                    # states tile
            resident_spec((S, PH)), resident_spec((1, PH)),
            resident_spec((PH, PF)), resident_spec((1, PF)),
            resident_spec((A, PC)), resident_spec((PF, PC)), resident_spec((1, PC)),
            resident_spec((1, PC)), resident_spec((1, 1)),
        ],
        out_specs=pl.BlockSpec((TB, PF), lambda i: (i, 0)),
        compiler_params=pltpu.CompilerParams(
            dimension_semantics=("parallel",),
            vmem_limit_bytes=32 * 1024 * 1024,
        ),
    )(info_p, states_p, w1, b1, w2, b2, w3a, w3b, b3, w4, b4)

    q_tot = out[:B, q_col:q_col + 1]
    state_features = out[:B, :feat]
    return {"q_tot": q_tot, "state_features": state_features}


def init_params(key, state_dim, hidden, feat_dim, info_dim, critic_hidden):
    ks = jax.random.split(key, 10)
    s = 0.1
    return {
        # feature_extractor
        "w1": s * jax.random.normal(ks[0], (state_dim, hidden), jnp.float32),
        "b1": s * jax.random.normal(ks[1], (1, hidden), jnp.float32),
        "w2": s * jax.random.normal(ks[2], (hidden, feat_dim), jnp.float32),
        "b2": s * jax.random.normal(ks[3], (1, feat_dim), jnp.float32),
        # critic_model (W3 split into the info part and the state-feature part)
        "w3a": s * jax.random.normal(ks[4], (info_dim, critic_hidden), jnp.float32),
        "w3b": s * jax.random.normal(ks[5], (feat_dim, critic_hidden), jnp.float32),
        "b3": s * jax.random.normal(ks[6], (1, critic_hidden), jnp.float32),
        "w4": s * jax.random.normal(ks[7], (critic_hidden, 1), jnp.float32),
        "b4": s * jax.random.normal(ks[8], (1, 1), jnp.float32),
    }


if __name__ == "__main__":
    # Small deterministic shapes
    B, N_AGENTS, A_DIM = 8, 4, 8          # info_from_agents: [8, 4, 8]
    STATE_DIM = 16                        # states: [8, 16]
    HIDDEN, FEAT_DIM, CRITIC_HIDDEN = 32, 32, 32
    INFO_DIM = N_AGENTS * A_DIM

    key = jax.random.PRNGKey(0)
    k_info, k_state, k_params = jax.random.split(key, 3)

    info_from_agents = jax.random.normal(k_info, (B, N_AGENTS, A_DIM), jnp.float32)
    states = jax.random.normal(k_state, (B, STATE_DIM), jnp.float32)
    params = init_params(k_params, STATE_DIM, HIDDEN, FEAT_DIM, INFO_DIM, CRITIC_HIDDEN)

    out = critic_forward(info_from_agents, states, params)
    jax.block_until_ready(out)

    # pure-JAX reference check
    info_flat = info_from_agents.reshape(B, -1)
    h1 = jnp.maximum(states @ params["w1"] + params["b1"], 0.0)
    sf_ref = jnp.maximum(h1 @ params["w2"] + params["b2"], 0.0)
    h3 = jnp.maximum(info_flat @ params["w3a"] + sf_ref @ params["w3b"] + params["b3"], 0.0)
    q_ref = h3 @ params["w4"] + params["b4"]

    assert out["q_tot"].shape == (B, 1)
    assert out["state_features"].shape == (B, FEAT_DIM)
    assert jnp.allclose(out["q_tot"], q_ref, atol=1e-5), "q_tot mismatch"
    assert jnp.allclose(out["state_features"], sf_ref, atol=1e-5), "state_features mismatch"

    print("KERNEL_OK")
</pallas_src>

<mosaic_0001>
module attributes {stable_mosaic.version = 11 : i64} {
  func.func @_critic_kernel(%arg0: i32, %arg1: memref<8x32xf32, #tpu.memory_space<vmem>>, %arg2: memref<8x16xf32, #tpu.memory_space<vmem>>, %arg3: memref<16x128xf32, #tpu.memory_space<vmem>>, %arg4: memref<1x128xf32, #tpu.memory_space<vmem>>, %arg5: memref<128x128xf32, #tpu.memory_space<vmem>>, %arg6: memref<1x128xf32, #tpu.memory_space<vmem>>, %arg7: memref<32x128xf32, #tpu.memory_space<vmem>>, %arg8: memref<128x128xf32, #tpu.memory_space<vmem>>, %arg9: memref<1x128xf32, #tpu.memory_space<vmem>>, %arg10: memref<1x128xf32, #tpu.memory_space<vmem>>, %arg11: memref<1x1xf32, #tpu.memory_space<vmem>>, %arg12: memref<8x128xf32, #tpu.memory_space<vmem>>) attributes {dimension_semantics = [#tpu.dimension_semantics<parallel>], iteration_bounds = array<i64: 1>, scalar_prefetch = 0 : i64, scratch_operands = 0 : i64, tpu.core_type = #tpu.core_type<tc>, window_params = [{transform_indices = @transform_0, window_bounds = array<i64: 8, 32>}, {transform_indices = @transform_1, window_bounds = array<i64: 8, 16>}, {pipeline_mode = #tpu.pipeline_mode<synchronous>, transform_indices = @transform_2, window_bounds = array<i64: 16, 128>}, {pipeline_mode = #tpu.pipeline_mode<synchronous>, transform_indices = @transform_3, window_bounds = array<i64: 1, 128>}, {pipeline_mode = #tpu.pipeline_mode<synchronous>, transform_indices = @transform_4, window_bounds = array<i64: 128, 128>}, {pipeline_mode = #tpu.pipeline_mode<synchronous>, transform_indices = @transform_5, window_bounds = array<i64: 1, 128>}, {pipeline_mode = #tpu.pipeline_mode<synchronous>, transform_indices = @transform_6, window_bounds = array<i64: 32, 128>}, {pipeline_mode = #tpu.pipeline_mode<synchronous>, transform_indices = @transform_7, window_bounds = array<i64: 128, 128>}, {pipeline_mode = #tpu.pipeline_mode<synchronous>, transform_indices = @transform_8, window_bounds = array<i64: 1, 128>}, {pipeline_mode = #tpu.pipeline_mode<synchronous>, transform_indices = @transform_9, window_bounds = array<i64: 1, 128>}, {pipeline_mode = #tpu.pipeline_mode<synchronous>, transform_indices = @transform_10, window_bounds = array<i64: 1, 1>}, {transform_indices = @transform_11, window_bounds = array<i64: 8, 128>}]} {
    %c0 = arith.constant 0 : index
    %c0_0 = arith.constant 0 : index
    %0 = vector.load %arg2[%c0, %c0_0] : memref<8x16xf32, #tpu.memory_space<vmem>>, vector<8x16xf32>
    %c0_1 = arith.constant 0 : index
    %c0_2 = arith.constant 0 : index
    %1 = vector.load %arg3[%c0_1, %c0_2] : memref<16x128xf32, #tpu.memory_space<vmem>>, vector<16x128xf32>
    %cst = arith.constant dense<0.000000e+00> : vector<8x128xf32>
    %2 = tpu.matmul %0, %1, %cst {dimension_numbers = #tpu.dot_dimension_numbers<[1], [0], [0], [1], [0, 0, 1, 1], [], []>} : vector<8x16xf32>, vector<16x128xf32>, vector<8x128xf32> -> vector<8x128xf32>
    %c0_3 = arith.constant 0 : index
    %c0_4 = arith.constant 0 : index
    %3 = vector.load %arg4[%c0_3, %c0_4] : memref<1x128xf32, #tpu.memory_space<vmem>>, vector<1x128xf32>
    %4 = vector.broadcast %3 : vector<1x128xf32> to vector<8x128xf32>
    %5 = arith.addf %2, %4 : vector<8x128xf32>
    %cst_5 = arith.constant 0.000000e+00 : f32
    %6 = vector.broadcast %cst_5 : f32 to vector<8x128xf32>
    %7 = arith.maximumf %5, %6 : vector<8x128xf32>
    %c0_6 = arith.constant 0 : index
    %c0_7 = arith.constant 0 : index
    %8 = vector.load %arg5[%c0_6, %c0_7] : memref<128x128xf32, #tpu.memory_space<vmem>>, vector<128x128xf32>
    %cst_8 = arith.constant dense<0.000000e+00> : vector<8x128xf32>
    %9 = tpu.matmul %7, %8, %cst_8 {dimension_numbers = #tpu.dot_dimension_numbers<[1], [0], [0], [1], [0, 0, 1, 1], [], []>} : vector<8x128xf32>, vector<128x128xf32>, vector<8x128xf32> -> vector<8x128xf32>
    %c0_9 = arith.constant 0 : index
    %c0_10 = arith.constant 0 : index
    %10 = vector.load %arg6[%c0_9, %c0_10] : memref<1x128xf32, #tpu.memory_space<vmem>>, vector<1x128xf32>
    %11 = vector.broadcast %10 : vector<1x128xf32> to vector<8x128xf32>
    %12 = arith.addf %9, %11 : vector<8x128xf32>
    %cst_11 = arith.constant 0.000000e+00 : f32
    %13 = vector.broadcast %cst_11 : f32 to vector<8x128xf32>
    %14 = arith.maximumf %12, %13 : vector<8x128xf32>
    %c0_12 = arith.constant 0 : index
    %c0_13 = arith.constant 0 : index
    %15 = vector.load %arg1[%c0_12, %c0_13] : memref<8x32xf32, #tpu.memory_space<vmem>>, vector<8x32xf32>
    %c0_14 = arith.constant 0 : index
    %c0_15 = arith.constant 0 : index
    %16 = vector.load %arg7[%c0_14, %c0_15] : memref<32x128xf32, #tpu.memory_space<vmem>>, vector<32x128xf32>
    %cst_16 = arith.constant dense<0.000000e+00> : vector<8x128xf32>
    %17 = tpu.matmul %15, %16, %cst_16 {dimension_numbers = #tpu.dot_dimension_numbers<[1], [0], [0], [1], [0, 0, 1, 1], [], []>} : vector<8x32xf32>, vector<32x128xf32>, vector<8x128xf32> -> vector<8x128xf32>
    %c0_17 = arith.constant 0 : index
    %c0_18 = arith.constant 0 : index
    %18 = vector.load %arg8[%c0_17, %c0_18] : memref<128x128xf32, #tpu.memory_space<vmem>>, vector<128x128xf32>
    %cst_19 = arith.constant dense<0.000000e+00> : vector<8x128xf32>
    %19 = tpu.matmul %14, %18, %cst_19 {dimension_numbers = #tpu.dot_dimension_numbers<[1], [0], [0], [1], [0, 0, 1, 1], [], []>} : vector<8x128xf32>, vector<128x128xf32>, vector<8x128xf32> -> vector<8x128xf32>
    %20 = arith.addf %17, %19 : vector<8x128xf32>
    %c0_20 = arith.constant 0 : index
    %c0_21 = arith.constant 0 : index
    %21 = vector.load %arg9[%c0_20, %c0_21] : memref<1x128xf32, #tpu.memory_space<vmem>>, vector<1x128xf32>
    %22 = vector.broadcast %21 : vector<1x128xf32> to vector<8x128xf32>
    %23 = arith.addf %20, %22 : vector<8x128xf32>
    %cst_22 = arith.constant 0.000000e+00 : f32
    %24 = vector.broadcast %cst_22 : f32 to vector<8x128xf32>
    %25 = arith.maximumf %23, %24 : vector<8x128xf32>
    %c0_23 = arith.constant 0 : index
    %c0_24 = arith.constant 0 : index
    %26 = vector.load %arg10[%c0_23, %c0_24] : memref<1x128xf32, #tpu.memory_space<vmem>>, vector<1x128xf32>
    %27 = vector.broadcast %26 : vector<1x128xf32> to vector<8x128xf32>
    %28 = arith.mulf %25, %27 : vector<8x128xf32>
    %cst_25 = arith.constant dense<0.000000e+00> : vector<8xf32>
    %29 = vector.multi_reduction <add>, %28, %cst_25 [1] : vector<8x128xf32> to vector<8xf32>
    %30 = vector.shape_cast %29 : vector<8xf32> to vector<8x1xf32>
    %c0_26 = arith.constant 0 : index
    %c0_27 = arith.constant 0 : index
    %31 = vector.load %arg11[%c0_26, %c0_27] : memref<1x1xf32, #tpu.memory_space<vmem>>, vector<1x1xf32>
    %32 = vector.broadcast %31 : vector<1x1xf32> to vector<8x1xf32>
    %33 = arith.addf %30, %32 : vector<8x1xf32>
    %34 = tpu.iota {dimensions = array<i32: 1>} : vector<8x128xi32>
    %c32_i32 = arith.constant 32 : i32
    %35 = vector.broadcast %c32_i32 : i32 to vector<8x128xi32>
    %36 = arith.cmpi eq, %34, %35 : vector<8x128xi32>
    %37 = vector.shape_cast %33 : vector<8x1xf32> to vector<8x1xf32>
    %38 = vector.broadcast %37 : vector<8x1xf32> to vector<8x128xf32>
    %39 = arith.select %36, %38, %14 : vector<8x128xi1>, vector<8x128xf32>
    %c0_28 = arith.constant 0 : index
    %c0_29 = arith.constant 0 : index
    %40 = vector.load %arg12[%c0_28, %c0_29] : memref<8x128xf32, #tpu.memory_space<vmem>>, vector<8x128xf32>
    tpu.vector_store %arg12[%c0_28, %c0_29], %39 {strides = array<i32>} : memref<8x128xf32, #tpu.memory_space<vmem>>, vector<8x128xf32>,
    return
  }
  func.func @transform_0(%arg0: i32) -> (i32, i32) {
    %c0_i32 = arith.constant 0 : i32
    %c0_i32_0 = arith.constant 0 : i32
    return %arg0, %c0_i32 : i32, i32
  }
  func.func @transform_1(%arg0: i32) -> (i32, i32) {
    %c0_i32 = arith.constant 0 : i32
    %c0_i32_0 = arith.constant 0 : i32
    return %arg0, %c0_i32 : i32, i32
  }
  func.func @transform_2(%arg0: i32) -> (i32, i32) {
    %c0_i32 = arith.constant 0 : i32
    %c0_i32_0 = arith.constant 0 : i32
    %c0_i32_1 = arith.constant 0 : i32
    return %c0_i32, %c0_i32_0 : i32, i32
  }
  func.func @transform_3(%arg0: i32) -> (i32, i32) {
    %c0_i32 = arith.constant 0 : i32
    %c0_i32_0 = arith.constant 0 : i32
    %c0_i32_1 = arith.constant 0 : i32
    return %c0_i32, %c0_i32_0 : i32, i32
  }
  func.func @transform_4(%arg0: i32) -> (i32, i32) {
    %c0_i32 = arith.constant 0 : i32
    %c0_i32_0 = arith.constant 0 : i32
    %c0_i32_1 = arith.constant 0 : i32
    return %c0_i32, %c0_i32_0 : i32, i32
  }
  func.func @transform_5(%arg0: i32) -> (i32, i32) {
    %c0_i32 = arith.constant 0 : i32
    %c0_i32_0 = arith.constant 0 : i32
    %c0_i32_1 = arith.constant 0 : i32
    return %c0_i32, %c0_i32_0 : i32, i32
  }
  func.func @transform_6(%arg0: i32) -> (i32, i32) {
    %c0_i32 = arith.constant 0 : i32
    %c0_i32_0 = arith.constant 0 : i32
    %c0_i32_1 = arith.constant 0 : i32
    return %c0_i32, %c0_i32_0 : i32, i32
  }
  func.func @transform_7(%arg0: i32) -> (i32, i32) {
    %c0_i32 = arith.constant 0 : i32
    %c0_i32_0 = arith.constant 0 : i32
    %c0_i32_1 = arith.constant 0 : i32
    return %c0_i32, %c0_i32_0 : i32, i32
  }
  func.func @transform_8(%arg0: i32) -> (i32, i32) {
    %c0_i32 = arith.constant 0 : i32
    %c0_i32_0 = arith.constant 0 : i32
    %c0_i32_1 = arith.constant 0 : i32
    return %c0_i32, %c0_i32_0 : i32, i32
  }
  func.func @transform_9(%arg0: i32) -> (i32, i32) {
    %c0_i32 = arith.constant 0 : i32
    %c0_i32_0 = arith.constant 0 : i32
    %c0_i32_1 = arith.constant 0 : i32
    return %c0_i32, %c0_i32_0 : i32, i32
  }
  func.func @transform_10(%arg0: i32) -> (i32, i32) {
    %c0_i32 = arith.constant 0 : i32
    %c0_i32_0 = arith.constant 0 : i32
    %c0_i32_1 = arith.constant 0 : i32
    return %c0_i32, %c0_i32_0 : i32, i32
  }
  func.func @transform_11(%arg0: i32) -> (i32, i32) {
    %c0_i32 = arith.constant 0 : i32
    %c0_i32_0 = arith.constant 0 : i32
    return %arg0, %c0_i32 : i32, i32
  }
}

</mosaic_0001>

<bundles_post_ra>
// kernel: tpu_custom_call.1
= control target key start
LH: loop header
LB: loop body
LE: loop exit
PB: predicated region body
PF: predicated region fallthrough
CT: control target
= control target key end

     0   :  { %s984_s0 = inlined_call_operand.hbm [shape: f32[8,32], index: 0, kind: input, shape index: {}]   ;;  %s985_s1 = inlined_call_operand.hbm [shape: f32[8,16], index: 1, kind: input, shape index: {}]   ;;  %s986_s2 = inlined_call_operand.hbm [shape: f32[16,128], index: 2, kind: input, shape index: {}]   ;;  %s987_s3 = inlined_call_operand.vmem [shape: f32[1,128], index: 3, kind: input, shape index: {}]   ;;  %s988_s4 = inlined_call_operand.hbm [shape: f32[128,128], index: 4, kind: input, shape index: {}]   ;;  %s989_s5 = inlined_call_operand.vmem [shape: f32[1,128], index: 5, kind: input, shape index: {}]   ;;  %s990_s6 = inlined_call_operand.hbm [shape: f32[32,128], index: 6, kind: input, shape index: {}]   ;;  %s991_s7 = inlined_call_operand.hbm [shape: f32[128,128], index: 7, kind: input, shape index: {}]   ;;  %s992_s8 = inlined_call_operand.vmem [shape: f32[1,128], index: 8, kind: input, shape index: {}]   ;;  %s993_s9 = inlined_call_operand.vmem [shape: f32[1,128], index: 9, kind: input, shape index: {}]   ;;  %s994_s10 = inlined_call_operand.<no memory space> [shape: f32[1,1], index: 10, kind: input, shape index: {}]   ;;  %s995_s11 = inlined_call_operand.hbm [shape: f32[8,128], index: 11, kind: output, shape index: {}]  }
   0x1   :  { %v16_v0 = vstv %s994_s10 }
   0x2   :  { %17 = vst [vmem:[#allocation2] sm:$0x1] %v16_v0 }
   0x3   :  { %18 = vsyncpa [#allocation4], 0 }
   0x4   :  { %19 = vsyncpa [#allocation7], 0 }
   0x5   :  { %20 = vsyncpa [#allocation10], 0 }
   0x6   :  { %21 = vsyncpa [#allocation13], 0 }
   0x7   :  { %22 = vsyncpa [#allocation5], 0  ;;  %s818_s19 = smov [#allocation6]  }
   0x8   :  { %s39_s20 = sshll.u32 %s818_s19, 4  ;;  %s40_s20 = int_to_ptr.vmem [resolvable:$true] %s39_s20 }
   0x9   :  { %s676_s21 = scalar_lea.vmem %s40_s20, 128  ;;  %p681_p1 = scmp.lt.s32.totalorder %s40_s20, %s40_s20 }
   0xa   :  { %p677_p0 = scmp.ne.s32.totalorder %s40_s20, %s676_s21  ;;  %p682_p2 = scmp.lt.s32.totalorder %s676_s21, %s676_s21 }
   0xc   :  { %p683_p3 = por %p682_p2, %p681_p1 }
   0xe   :  { %p684_p4 = pnand %p683_p3, %p677_p0 }
  0x10   :  { %687 = shalt.err (!%p684_p4)
}
  0x11   :  { %42 = dma.hbm_to_vmem [thread:$0]  %s985_s1, 128, %s40_s20, [#allocation7]  }
  0x12   :  { %s819_s10 = smov [#allocation9]   ;;  %s820_s25 = smov [#allocation3]  }
  0x13   :  { %s62_s24 = sshll.u32 %s819_s10, 4  ;;  %s29_s26 = sshll.u32 %s820_s25, 4  ;;  %s63_s24 = int_to_ptr.vmem [resolvable:$true] %s62_s24  ;;  %s30_s26 = int_to_ptr.vmem [resolvable:$true] %s29_s26 }
  0x14   :  { %s696_s27 = scalar_lea.vmem %s63_s24, 2048  ;;  %p701_p6 = scmp.lt.s32.totalorder %s63_s24, %s63_s24 }
  0x15   :  { %p697_p5 = scmp.ne.s32.totalorder %s63_s24, %s696_s27  ;;  %p702_p7 = scmp.lt.s32.totalorder %s696_s27, %s696_s27 }
  0x17   :  { %p703_p8 = por %p702_p7, %p701_p6 }
  0x19   :  { %p704_p9 = pnand %p703_p8, %p697_p5 }
  0x1b   :  { %707 = shalt.err (!%p704_p9)
}
  0x1c   :  { %s821_s28 = smov 128   ;;  %s822_s29 = smov 8  }
  0x1d   :  { %68 = dma.hbm_to_vmem [thread:$0]  %s988_s4, 2048, %s63_s24, [#allocation10], %s821_s28, %s821_s28, %s822_s29  }
  0x1e   :  { %s716_s1 = scalar_lea.vmem %s30_s26, 128  ;;  %p721_p11 = scmp.lt.s32.totalorder %s30_s26, %s30_s26 }
  0x1f   :  { %p717_p10 = scmp.ne.s32.totalorder %s30_s26, %s716_s1  ;;  %p722_p12 = scmp.lt.s32.totalorder %s716_s1, %s716_s1 }
  0x21   :  { %p723_p13 = por %p722_p12, %p721_p11 }
  0x23   :  { %p724_p0 = pnand %p723_p13, %p717_p10 }
  0x25   :  { %727 = shalt.err (!%p724_p0)
}
  0x26   :  { %32 = dma.hbm_to_vmem [thread:$0]  %s984_s0, 128, %s30_s26, [#allocation4]  }
  0x27   :  { %s823_s15 = smov [#allocation8]   ;;  %s824_s17 = smov [#allocation11]  }
  0x28   :  { %s48_s16 = sshll.u32 %s823_s15, 4  ;;  %s76_s18 = sshll.u32 %s824_s17, 4  ;;  %s49_s16 = int_to_ptr.vmem [resolvable:$true] %s48_s16  ;;  %s77_s18 = int_to_ptr.vmem [resolvable:$true] %s76_s18 }
  0x29   :  { %s736_s19 = scalar_lea.vmem %s49_s16, 256  ;;  %p741_p2 = scmp.lt.s32.totalorder %s49_s16, %s49_s16 }
  0x2a   :  { %p737_p1 = scmp.ne.s32.totalorder %s49_s16, %s736_s19  ;;  %p742_p3 = scmp.lt.s32.totalorder %s736_s19, %s736_s19 }
  0x2c   :  { %p743_p4 = por %p742_p3, %p741_p2 }
  0x2e   :  { %p744_p5 = pnand %p743_p4, %p737_p1 }
  0x30   :  { %747 = shalt.err (!%p744_p5)
}
  0x31   :  { %54 = dma.hbm_to_vmem [thread:$0]  %s986_s2, 256, %s49_s16, [#allocation7], %s821_s28, %s821_s28, %s822_s29  }
  0x32   :  { %s756_s0 = scalar_lea.vmem %s77_s18, 512  ;;  %p761_p7 = scmp.lt.s32.totalorder %s77_s18, %s77_s18 }
  0x33   :  { %p757_p6 = scmp.ne.s32.totalorder %s77_s18, %s756_s0  ;;  %p762_p8 = scmp.lt.s32.totalorder %s756_s0, %s756_s0 }
  0x35   :  { %p763_p9 = por %p762_p8, %p761_p7 }
  0x37   :  { %p764_p10 = pnand %p763_p9, %p757_p6 }
  0x39   :  { %767 = shalt.err (!%p764_p10)
}
  0x3a   :  { %82 = dma.hbm_to_vmem [thread:$0]  %s990_s6, 512, %s77_s18, [#allocation10], %s821_s28, %s821_s28, %s822_s29  }
  0x3b   :  { %s825_s23 = smov [#allocation12]  }
  0x3c   :  { %s88_s10 = sshll.u32 %s825_s23, 4  ;;  %s89_s10 = int_to_ptr.vmem [resolvable:$true] %s88_s10 }
  0x3d   :  { %s776_s24 = scalar_lea.vmem %s89_s10, 2048  ;;  %p781_p12 = scmp.lt.s32.totalorder %s89_s10, %s89_s10 }
  0x3e   :  { %p777_p11 = scmp.ne.s32.totalorder %s89_s10, %s776_s24  ;;  %p782_p13 = scmp.lt.s32.totalorder %s776_s24, %s776_s24 }
  0x40   :  { %p783_p0 = por %p782_p13, %p781_p12 }
  0x42   :  { %p784_p1 = pnand %p783_p0, %p777_p11 }
  0x44   :  { %787 = shalt.err (!%p784_p1)
}
  0x45   :  { %94 = dma.hbm_to_vmem [thread:$0]  %s991_s7, 2048, %s89_s10, [#allocation13], %s821_s28, %s821_s28, %s822_s29  }
  0x46   :  { %808 = dma.done.wait [#allocation4], 128  }
  0x47   :  { %809 = vsyncadd [#allocation4], 4294967168 }
  0x48   :  { %810 = dma.done.wait [#allocation7], 384  }
  0x49   :  { %811 = vsyncadd [#allocation7], 4294966912 }
  0x4a   :  { %812 = dma.done.wait [#allocation10], 2560  }
  0x4b   :  { %813 = vsyncadd [#allocation10], 4294964736 }
  0x4c   :  { %814 = dma.done.wait [#allocation13], 2048  }
  0x4d   :  { %815 = vsyncadd [#allocation13], 4294965248  ;;  %v826_v1 = vmov 0.0   ;;  %vm827_vm0 = vmmov 0   ;;  %v121_v2 = vld [vmem:[#allocation8 + $0x8] sm:$0xff]  ;;  %v120_v3 = vld [vmem:[#allocation8] sm:$0xff] }
  0x4e   :  { %567 = vmatprep.subr.mxu0 %v826_v1  ;;  %571 = vmatprep.mubr.msk.f32.mxu0 %vm827_vm0, %v826_v1  ;;  %v119_v4 = vld [vmem:[#allocation6] sm:$0xff]  ;;  %vm129_vm1 = vcmask 130048   ;;  %v219_v5 = vld [vmem:[#allocation9 + $0x78] sm:$0xff]  ;;  %v218_v6 = vld [vmem:[#allocation9 + $0x70] sm:$0xff]  ;;  %vm389_vm2 = vcmask 261120   ;;  %v828_v62 = vmov 0  }
  0x4f   :  { %574 = vmatprep.subr.mxu1 %v826_v1  ;;  %606 = vmatprep.mubr.msk.f32.mxu1 %vm827_vm0, %v826_v1  ;;  %v217_v7 = vld [vmem:[#allocation9 + $0x68] sm:$0xff]  ;;  %v216_v8 = vld [vmem:[#allocation9 + $0x60] sm:$0xff]  ;;  %v215_v9 = vld [vmem:[#allocation9 + $0x58] sm:$0xff] }
  0x50   :  { %568 = vmatpush3.msra.mxu0 %v121_v2  ;;  %575 = vmatpush3.msra.mxu1 %v219_v5  ;;  %v214_v10 = vld [vmem:[#allocation9 + $0x50] sm:$0xff]  ;;  %v213_v11 = vld [vmem:[#allocation9 + $0x48] sm:$0xff]  ;;  %v212_v12 = vld [vmem:[#allocation9 + $0x40] sm:$0xff]  ;;  %v490_v2 = vlaneseq }
  0x51   :  { %569 = vmatprep.subr.mxu0 %v826_v1  ;;  %576 = vmatprep.subr.mxu1 %v826_v1  ;;  %v211_v13 = vld [vmem:[#allocation9 + $0x38] sm:$0xff]  ;;  %v210_v14 = vld [vmem:[#allocation9 + $0x30] sm:$0xff]  ;;  %v209_v15 = vld [vmem:[#allocation9 + $0x28] sm:$0xff] }
  0x52   :  { %570 = vmatpush3.msra.mxu0 %v120_v3  ;;  %577 = vmatpush3.msra.mxu1 %v218_v6  ;;  %v208_v16 = vld [vmem:[#allocation9 + $0x20] sm:$0xff]  ;;  %v207_v17 = vld [vmem:[#allocation9 + $0x18] sm:$0xff]  ;;  %v206_v18 = vld [vmem:[#allocation9 + $0x10] sm:$0xff]  ;;  %v491_v3 = vand.u32 127, %v490_v2 }
  0x53   :  { %572 = vmatmul.mubr.msk.f32.vlgmr.msra.gmra.mxu0 %vm129_vm1, %v119_v4  ;;  %578 = vmatprep.subr.mxu1 %v826_v1  ;;  %v205_v19 = vld [vmem:[#allocation9 + $0x8] sm:$0xff]  ;;  %v204_v20 = vld [vmem:[#allocation9] sm:$0xff]  ;;  %v318_v21 = vld [vmem:[#allocation12 + $0x78] sm:$0xff] }
  0x54   :  { %609 = vmatprep.subr.mxu0 %v826_v1  ;;  %579 = vmatpush3.msra.mxu1 %v217_v7  ;;  %v317_v22 = vld [vmem:[#allocation12 + $0x70] sm:$0xff]  ;;  %v316_v23 = vld [vmem:[#allocation12 + $0x68] sm:$0xff]  ;;  %v315_v24 = vld [vmem:[#allocation12 + $0x60] sm:$0xff]  ;;  %vm492_vm3 = vcmp.eq.s32.totalorder %v491_v3, 32 }
  0x55   :  { %641 = vmatprep.mubr.msk.f32.mxu0 %vm827_vm0, %v826_v1  ;;  %580 = vmatprep.subr.mxu1 %v826_v1  ;;  %v314_v25 = vld [vmem:[#allocation12 + $0x58] sm:$0xff]  ;;  %v313_v26 = vld [vmem:[#allocation12 + $0x50] sm:$0xff]  ;;  %v312_v27 = vld [vmem:[#allocation12 + $0x48] sm:$0xff] }
  0x56   :  { %581 = vmatpush3.msra.mxu1 %v216_v8  ;;  %610 = vmatpush3.msra.mxu0 %v318_v21  ;;  %v311_v28 = vld [vmem:[#allocation12 + $0x40] sm:$0xff]  ;;  %v310_v29 = vld [vmem:[#allocation12 + $0x38] sm:$0xff]  ;;  %v309_v30 = vld [vmem:[#allocation12 + $0x30] sm:$0xff] }
  0x57   :  { %582 = vmatprep.subr.mxu1 %v826_v1  ;;  %611 = vmatprep.subr.mxu0 %v826_v1  ;;  %v308_v31 = vld [vmem:[#allocation12 + $0x28] sm:$0xff]  ;;  %v307_v32 = vld [vmem:[#allocation12 + $0x20] sm:$0xff]  ;;  %v306_v33 = vld [vmem:[#allocation12 + $0x18] sm:$0xff] }
  0x58   :  { %583 = vmatpush3.msra.mxu1 %v215_v9  ;;  %612 = vmatpush3.msra.mxu0 %v317_v22  ;;  %v518_v34 = vld [vmem:[%s987_s3] ss:$0 sm:$0xff]  ;;  %v301_v40 = vld [vmem:[#allocation11 + $0x10] sm:$0xff]  ;;  %v300_v42 = vld [vmem:[#allocation11 + $0x8] sm:$0xff] }
  0x59   :  { %584 = vmatprep.subr.mxu1 %v826_v1  ;;  %613 = vmatprep.subr.mxu0 %v826_v1  ;;  %v302_v39 = vld [vmem:[#allocation11 + $0x18] sm:$0xff]  ;;  %v305_v41 = vld [vmem:[#allocation12 + $0x10] sm:$0xff]  ;;  %v304_v43 = vld [vmem:[#allocation12 + $0x8] sm:$0xff] }
  0x5a   :  { %585 = vmatpush3.msra.mxu1 %v214_v10  ;;  %614 = vmatpush3.msra.mxu0 %v316_v23  ;;  %v299_v44 = vld [vmem:[#allocation11] sm:$0xff]  ;;  %v520_v47 = vld [vmem:[%s989_s5] ss:$0 sm:$0xff]  ;;  %s829_s5 = smov [#allocation14]  }
  0x5b   :  { %586 = vmatprep.subr.mxu1 %v826_v1  ;;  %615 = vmatprep.subr.mxu0 %v826_v1  ;;  %v298_v45 = vld [vmem:[#allocation3] sm:$0xff]  ;;  %v522_v55 = vld [vmem:[%s992_s8] ss:$0 sm:$0xff]  ;;  %s506_s8 = sshll.u32 %s829_s5, 4  ;;  %s507_s8 = int_to_ptr.vmem [resolvable:$true] %s506_s8 }
  0x5c   :  { %587 = vmatpush3.msra.mxu1 %v213_v11  ;;  %616 = vmatpush3.msra.mxu0 %v315_v24  ;;  %v303_v46 = vld [vmem:[#allocation12] sm:$0xff]  ;;  %v523_v59 = vld [vmem:[%s993_s9] ss:$0 sm:$0xff]  ;;  %s788_s12 = scalar_lea.vmem %s507_s8, 128  ;;  %p793_p3 = scmp.lt.s32.totalorder %s507_s8, %s507_s8 }
  0x5d   :  { %588 = vmatprep.subr.mxu1 %v826_v1  ;;  %617 = vmatprep.subr.mxu0 %v826_v1  ;;  %v524_v63 = vld [vmem:[#allocation2] ss:$0 sm:$0xff]  ;;  %p789_p2 = scmp.ne.s32.totalorder %s507_s8, %s788_s12  ;;  %p794_p4 = scmp.lt.s32.totalorder %s788_s12, %s788_s12 }
  0x5e   :  { %589 = vmatpush3.msra.mxu1 %v212_v12  ;;  %618 = vmatpush3.msra.mxu0 %v314_v25 }
  0x5f   :  { %590 = vmatprep.subr.mxu1 %v826_v1  ;;  %619 = vmatprep.subr.mxu0 %v826_v1  ;;  %p795_p5 = por %p794_p4, %p793_p3 }
  0x60   :  { %591 = vmatpush3.msra.mxu1 %v211_v13  ;;  %620 = vmatpush3.msra.mxu0 %v313_v26 }
  0x61   :  { %592 = vmatprep.subr.mxu1 %v826_v1  ;;  %621 = vmatprep.subr.mxu0 %v826_v1  ;;  %p796_p6 = pnand %p795_p5, %p789_p2 }
  0x62   :  { %593 = vmatpush3.msra.mxu1 %v210_v14  ;;  %622 = vmatpush3.msra.mxu0 %v312_v27 }
  0x63   :  { %594 = vmatprep.subr.mxu1 %v826_v1  ;;  %623 = vmatprep.subr.mxu0 %v826_v1 }
  0x64   :  { %595 = vmatpush3.msra.mxu1 %v209_v15  ;;  %624 = vmatpush3.msra.mxu0 %v311_v28 }
  0x65   :  { %596 = vmatprep.subr.mxu1 %v826_v1  ;;  %625 = vmatprep.subr.mxu0 %v826_v1 }
  0x66   :  { %597 = vmatpush3.msra.mxu1 %v208_v16  ;;  %626 = vmatpush3.msra.mxu0 %v310_v29 }
  0x67   :  { %598 = vmatprep.subr.mxu1 %v826_v1  ;;  %627 = vmatprep.subr.mxu0 %v826_v1 }
  0x68   :  { %599 = vmatpush3.msra.mxu1 %v207_v17  ;;  %628 = vmatpush3.msra.mxu0 %v309_v30 }
  0x69   :  { %600 = vmatprep.subr.mxu1 %v826_v1  ;;  %629 = vmatprep.subr.mxu0 %v826_v1 }
  0x6a   :  { %601 = vmatpush3.msra.mxu1 %v206_v18  ;;  %630 = vmatpush3.msra.mxu0 %v308_v31 }
  0x6b   :  { %602 = vmatprep.subr.mxu1 %v826_v1  ;;  %631 = vmatprep.subr.mxu0 %v826_v1 }
  0x6c   :  { %603 = vmatpush3.msra.mxu1 %v205_v19  ;;  %632 = vmatpush3.msra.mxu0 %v307_v32 }
  0x6d   :  { %604 = vmatprep.subr.mxu1 %v826_v1  ;;  %633 = vmatprep.subr.mxu0 %v826_v1 }
  0x6e   :  { %605 = vmatpush3.msra.mxu1 %v204_v20  ;;  %634 = vmatpush3.msra.mxu0 %v306_v33 }
  0x6f   :  { %644 = vmatprep.subr.mxu1 %v826_v1  ;;  %635 = vmatprep.subr.mxu0 %v826_v1 }
  0x70   :  { %636 = vmatpush3.msra.mxu0 %v305_v41  ;;  %667 = vset.pattern.permute.xlu0 %v828_v62 }
  0x71   :  { %637 = vmatprep.subr.mxu0 %v826_v1 }
  0x72   :  { %638 = vmatpush3.msra.mxu0 %v304_v43 }
  0x73   :  { %639 = vmatprep.subr.mxu0 %v826_v1 }
  0x74   :  { %640 = vmatpush3.msra.mxu0 %v303_v46 }
 0x113   :  { %v199_v35 = vpop.f32.mrf.mxu0 }
 0x114   :  { %v200_v36 = vadd.f32 %v518_v34, %v199_v35 }
 0x115   :  { %v573_v37 = vpop.f32.mrf.mxu0 }
 0x116   :  { %v203_v38 = vmax.f32 %v200_v36, 0.0 }
 0x118   :  { %607 = vmatmul.mubr.f32.vlgmr.msra.gmra.mxu1 %v203_v38 }
 0x119   :  { %645 = vmatpush3.msra.mxu1 %v302_v39  ;;  %652 = vmatprep.mubr.msk.f32.mxu1 %vm827_vm0, %v826_v1 }
 0x11a   :  { %646 = vmatprep.subr.mxu1 %v826_v1 }
 0x11b   :  { %647 = vmatpush3.msra.mxu1 %v301_v40 }
 0x11c   :  { %648 = vmatprep.subr.mxu1 %v826_v1 }
 0x11d   :  { %649 = vmatpush3.msra.mxu1 %v300_v42 }
 0x11e   :  { %650 = vmatprep.subr.mxu1 %v826_v1 }
 0x11f   :  { %651 = vmatpush3.msra.mxu1 %v299_v44 }
 0x120   :  { %653 = vmatmul.mubr.msk.f32.vlgmr.msra.gmra.mxu1 %vm389_vm2, %v298_v45 }
 0x1d8   :  { %v293_v48 = vpop.f32.mrf.mxu1 }
 0x1d9   :  { %v294_v49 = vadd.f32 %v520_v47, %v293_v48 }
 0x1da   :  { %v608_v50 = vpop.f32.mrf.mxu1 }
 0x1db   :  { %v297_v51 = vmax.f32 %v294_v49, 0.0 }
 0x1dd   :  { %642 = vmatmul.mubr.f32.vlgmr.msra.gmra.mxu0 %v297_v51 }
 0x1e0   :  { %v459_v52 = vpop.f32.mrf.mxu1 }
 0x1e2   :  { %v654_v53 = vpop.f32.mrf.mxu1 }
 0x29d   :  { %v385_v54 = vpop.f32.mrf.mxu0 }
 0x29e   :  { %v460_v56 = vadd.f32 %v459_v52, %v385_v54 }
 0x29f   :  { %v643_v57 = vpop.f32.mrf.mxu0 }
 0x2a0   :  { %v470_v58 = vadd.f32 %v522_v55, %v460_v56 }
 0x2a2   :  { %v471_v60 = vmax.f32 %v470_v58, 0.0 }
 0x2a4   :  { %v479_v61 = vmul.f32 %v523_v59, %v471_v60 }
 0x2a6   :  { %480 = vadd.xlane.f32.xlu0 %v479_v61 }
 0x32f   :  { %v481_v0 = vpop.xlane.xlu0 %480 }
 0x330   :  { %v489_v1 = vadd.f32 %v524_v63, %v481_v0 }
 0x332   :  { %495 = vperm.xlu0 %667, %v489_v1  }
 0x3ad   :  { %v496_v4 = vpop.permute.xlu0 %495 }
 0x3ae   :  { %v498_v5 = vsel %vm492_vm3, %v496_v4, %v297_v51 }
 0x3af   :  { %499 = vst [vmem:[#allocation14] sm:$0xff] %v498_v5 }
 0x3b0   :  { %799 = shalt.err (!%p796_p6)
}
 0x3b1   :  { %509 = dma.vmem_to_hbm [thread:$0]  %s507_s8, 128, %s995_s11, [#allocation5]  }
 0x3b2   :  { %816 = dma.done.wait [#allocation5], 128  }
 0x3b3   :  { %817 = vsyncadd [#allocation5], 4294967168 }
 0x3b4   :  { %513 = vsyncpa [#allocation4], 1 }
 0x3b5   :  { %514 = vsyncpa [#allocation7], 1 }
 0x3b6   :  { %515 = vsyncpa [#allocation10], 1 }
 0x3b7   :  { %516 = vsyncpa [#allocation13], 1 }
 0x3b8   :  { %517 = vsyncpa [#allocation5], 1 }

</bundles_post_ra>
